<compile_context>
chip_gen: v6e
topology: v6e:2x2x1
jax: 0.10.0
libtpu: 0.0.40
codegen_flags: <defaults>
</compile_context>

<pallas_src>
import functools

import numpy as np
import jax
import jax.numpy as jnp
from jax.experimental import pallas as pl
from jax.experimental.pallas import tpu as pltpu

_KS = 5        # conv kernel size
_EPS = 1e-5


# ---------------------------------------------------------------------------
# pltpu.roll direction probe (one tiny kernel, run once, cached).
# ---------------------------------------------------------------------------
@functools.lru_cache(maxsize=None)
def _roll_matches_numpy():
    """True iff pltpu.roll(x, s, axis) == np.roll(x, s, axis)."""
    def k(x_ref, o_ref):
        o_ref[...] = pltpu.roll(x_ref[...], 1, axis=1)

    x = jnp.tile(jnp.arange(128, dtype=jnp.float32)[None, :], (8, 1))
    y = pl.pallas_call(
        k,
        out_shape=jax.ShapeDtypeStruct((8, 128), jnp.float32),
        in_specs=[pl.BlockSpec(memory_space=pltpu.MemorySpace.VMEM)],
        out_specs=pl.BlockSpec(memory_space=pltpu.MemorySpace.VMEM),
    )(x)
    return bool(jax.device_get(y)[0, 0] == 127.0)   # np.roll([0..127],1)[0]==127


def _tap_shifts_and_masks(size, hwp):
    """Per-tap lane-roll amounts + (25, 1, HWp) 0/1 validity masks (pad lanes 0)."""
    hw, pad = size * size, (_KS - 1) // 2
    numpy_dir = _roll_matches_numpy()
    yy, xx = np.meshgrid(np.arange(size), np.arange(size), indexing="ij")
    shifts = []
    masks = np.zeros((_KS * _KS, 1, hwp), np.float32)
    for i in range(_KS):
        for j in range(_KS):
            di, dj = i - pad, j - pad
            off = di * size + dj                       # flat source offset
            valid = ((yy + di >= 0) & (yy + di < size) &
                     (xx + dj >= 0) & (xx + dj < size)).reshape(-1)
            masks[i * _KS + j, 0, :hw] = valid.astype(np.float32)
            shifts.append(((-off) if numpy_dir else off) % hwp)
    return tuple(shifts), jnp.asarray(masks)


# ---------------------------------------------------------------------------
# Kernel
# ---------------------------------------------------------------------------
def _decoder_block_kernel(x_ref, lng_ref, lnb_ref,
                          w1_ref, b1_ref,
                          w5_ref, b5_ref, m5_ref,
                          w3_ref, b3_ref,
                          ws1_ref, bs1_ref, ws2_ref, bs2_ref, lanem_ref,
                          o_ref, stack_ref,
                          *, shifts, hw):
    x_in = x_ref[...]                       # (D, HWp) f32; lanes >= hw are 0
    D, HWp = x_in.shape
    inv_n = 1.0 / float(D * hw)
    lane_m = lanem_ref[...]                 # (1, HWp): 1 on real lanes, 0 on pad

    def layernorm(v, idx):
        # nn.LayerNorm([D, S, S]) == one mean/var over all D*hw real elements.
        # One-pass: sum and sum-of-squares (padding lanes are exactly 0).
        s1 = jnp.sum(jnp.sum(v, axis=1, keepdims=True), axis=0, keepdims=True)
        s2 = jnp.sum(jnp.sum(v * v, axis=1, keepdims=True), axis=0, keepdims=True)
        mu = s1 * inv_n
        var = s2 * inv_n - mu * mu
        # gamma/beta are zero-padded -> padding lanes stay exactly 0.
        return (v - mu) * jax.lax.rsqrt(var + _EPS) * lng_ref[idx] + lnb_ref[idx]

    def conv1x1(w_r, b_r, v):               # (D, D) @ (D, HWp) on the MXU
        o = jnp.dot(w_r[...], v, preferred_element_type=jnp.float32)
        return (o + b_r[...]) * lane_m       # mask keeps padding lanes at 0

    # --- LN -> Conv1x1 -> LN -> SiLU ---
    h = layernorm(x_in, 0)
    h = conv1x1(w1_ref, b1_ref, h)
    h = layernorm(h, 1)
    h = h * jax.nn.sigmoid(h)                # SiLU (EUP sigmoid)

    # --- Conv2D 5x5, stride 1, pad 2 ---
    # 25 XLU lane-rolls + 0/1 boundary masks build the shifted-tap stack in a
    # VMEM scratch; ONE MXU matmul (D, 25*D) @ (25*D, HWp) does the whole conv.
    for k, sft in enumerate(shifts):
        hk = h if sft == 0 else pltpu.roll(h, sft, axis=1)
        stack_ref[k * D:(k + 1) * D, :] = hk * m5_ref[k]
    conv = jnp.dot(w5_ref[...], stack_ref[...], preferred_element_type=jnp.float32)
    h = (conv + b5_ref[...]) * lane_m

    h = layernorm(h, 2)
    h = h * jax.nn.sigmoid(h)
    h = conv1x1(w3_ref, b3_ref, h)
    h = layernorm(h, 3)

    # --- SE (K=1 and K=nh(=4) linears as cheap VPU broadcast-FMAs) ---
    m = jnp.sum(h, axis=1, keepdims=True) * (1.0 / float(hw))       # (D, 1)
    hid = jnp.maximum(m * ws1_ref[...] + bs1_ref[...], 0.0)         # (D, nh)
    ws2 = ws2_ref[...]                                              # (nh, HWp)
    s = hid[:, 0:1] * ws2[0:1, :]
    for j in range(1, ws2.shape[0]):
        s = s + hid[:, j:j + 1] * ws2[j:j + 1, :]
    s = jax.nn.sigmoid(s + bs2_ref[...])                            # (D, HWp)

    # --- residual ---
    o_ref[...] = x_in + 0.1 * (h * s)


# ---------------------------------------------------------------------------
# Builder: pack parameters once, return a jitted forward.
# ---------------------------------------------------------------------------
def build_decoder_block(params, dim, size):
    """Returns a jitted callable f(x: (dim,size,size) f32) -> (dim,size,size)."""
    assert size in (12, 6)
    D, HW = dim, size * size
    HWp = 256 if HW > 128 else 128           # lane-pad to a multiple of 128

    def pad_lanes(a):
        a = jnp.asarray(a, jnp.float32).reshape(-1, HW)
        return jnp.pad(a, ((0, 0), (0, HWp - HW)))

    # LayerNorm affines: (4, D, HWp), zero on padding lanes.
    ln_g = jnp.stack([pad_lanes(g) for g, _ in params["ln"]])
    ln_b = jnp.stack([pad_lanes(b) for _, b in params["ln"]])

    w1, c1b = params["conv1"]
    w5, c5b = params["conv5"]
    w3, c3b = params["conv3"]
    # W_flat[o, (kh*5+kw)*D + c] = W[o, c, kh, kw]  -> one long-K MXU matmul.
    w5f = jnp.transpose(jnp.asarray(w5, jnp.float32),
                        (0, 2, 3, 1)).reshape(D, _KS * _KS * D)

    sw1, sb1, sw2, sb2 = params["se"] if size == 12 else params["se2"]
    nh = int(sw1.shape[1])

    shifts, tap_masks = _tap_shifts_and_masks(size, HWp)
    lane_mask = jnp.zeros((1, HWp), jnp.float32).at[:, :HW].set(1.0)

    packed = (
        ln_g, ln_b,
        jnp.asarray(w1, jnp.float32).reshape(D, D),
        jnp.asarray(c1b, jnp.float32).reshape(D, 1),
        w5f,
        jnp.asarray(c5b, jnp.float32).reshape(D, 1),
        tap_masks,
        jnp.asarray(w3, jnp.float32).reshape(D, D),
        jnp.asarray(c3b, jnp.float32).reshape(D, 1),
        jnp.asarray(sw1, jnp.float32).reshape(1, nh),
        jnp.asarray(sb1, jnp.float32).reshape(1, nh),
        pad_lanes(sw2),
        pad_lanes(sb2),
        lane_mask,
    )

    flops = int(2 * D * (_KS * _KS * D) * HWp        # 5x5 conv matmul
                + 2 * (2 * D * D * HWp)              # two 1x1 convs
                + 2 * D * nh * HWp                   # SE expansion
                + 40 * D * HWp)                      # LN / SiLU / SE misc
    bytes_accessed = int(sum(int(a.size) * 4 for a in packed) + 2 * D * HWp * 4)
    cost = pl.CostEstimate(flops=flops,
                           transcendentals=int(3 * D * HWp),
                           bytes_accessed=bytes_accessed)

    kernel = functools.partial(_decoder_block_kernel, shifts=shifts, hw=HW)
    pallas_fn = pl.pallas_call(
        kernel,
        out_shape=jax.ShapeDtypeStruct((D, HWp), jnp.float32),
        in_specs=[pl.BlockSpec(memory_space=pltpu.MemorySpace.VMEM)
                  for _ in range(1 + len(packed))],
        out_specs=pl.BlockSpec(memory_space=pltpu.MemorySpace.VMEM),
        scratch_shapes=[pltpu.VMEM((_KS * _KS * D, HWp), jnp.float32)],
        cost_estimate=cost,
    )

    @jax.jit
    def forward(x):
        xf = jnp.pad(jnp.asarray(x, jnp.float32).reshape(D, HW),
                     ((0, 0), (0, HWp - HW)))
        out = pallas_fn(xf, *packed)
        return out[:, :HW].reshape(D, size, size)

    return forward


# ---------------------------------------------------------------------------
# Params + pure-JAX reference
# ---------------------------------------------------------------------------
def init_params(key, dim, size, output_dim):
    nh = max(output_dim // 16, 4)
    ks = iter(jax.random.split(key, 11))

    def uni(k, shape, bound):
        return jax.random.uniform(k, shape, jnp.float32, -bound, bound)

    def conv_init(k, cin, cout, ksize):
        kw, kb = jax.random.split(k)
        bound = 1.0 / float(cin * ksize * ksize) ** 0.5
        return uni(kw, (cout, cin, ksize, ksize), bound), uni(kb, (cout,), bound)

    def linear_init(k, fin, fout):
        kw, kb = jax.random.split(k)
        bound = 1.0 / float(fin) ** 0.5
        return uni(kw, (fin, fout), bound), uni(kb, (fout,), bound)

    def ln_init(k):
        kg, kb = jax.random.split(k)
        g = 1.0 + 0.1 * jax.random.normal(kg, (dim, size, size), jnp.float32)
        b = 0.1 * jax.random.normal(kb, (dim, size, size), jnp.float32)
        return g, b

    return {
        "ln": [ln_init(next(ks)) for _ in range(4)],
        "conv1": conv_init(next(ks), dim, dim, 1),
        "conv5": conv_init(next(ks), dim, dim, 5),
        "conv3": conv_init(next(ks), dim, dim, 1),
        "se": linear_init(next(ks), 1, nh) + linear_init(next(ks), nh, 144),
        "se2": linear_init(next(ks), 1, nh) + linear_init(next(ks), nh, 36),
    }


def ref_forward(x, params):
    """Pure-JAX reference matching the PyTorch Decoder_Block.forward."""
    D, S, _ = x.shape
    eps = 1e-5
    hi = jax.lax.Precision.HIGHEST

    def ln(v, gb):
        g, b = gb
        mu = jnp.mean(v)
        var = jnp.mean((v - mu) ** 2)
        return (v - mu) / jnp.sqrt(var + eps) * g + b

    def conv(v, wb, pad):
        w, b = wb
        o = jax.lax.conv_general_dilated(
            v[None], w, window_strides=(1, 1),
            padding=[(pad, pad), (pad, pad)],
            dimension_numbers=("NCHW", "OIHW", "NCHW"), precision=hi)
        return o[0] + b[:, None, None]

    h = ln(x, params["ln"][0])
    h = conv(h, params["conv1"], 0)
    h = ln(h, params["ln"][1])
    h = h * jax.nn.sigmoid(h)
    h = conv(h, params["conv5"], 2)
    h = ln(h, params["ln"][2])
    h = h * jax.nn.sigmoid(h)
    h = conv(h, params["conv3"], 0)
    h = ln(h, params["ln"][3])

    w1, b1, w2, b2 = params["se"] if S == 12 else params["se2"]
    m = jnp.mean(h, axis=(1, 2))[:, None]                       # (D, 1)
    hid = jnp.maximum(jnp.matmul(m, w1, precision=hi) + b1[None, :], 0.0)
    s = jax.nn.sigmoid(jnp.matmul(hid, w2, precision=hi) + b2[None, :])
    return x + 0.1 * (h * s.reshape(D, S, S))


# ---------------------------------------------------------------------------
if __name__ == "__main__":
    key = jax.random.PRNGKey(0)
    kp12, kp6, kx12, kx6 = jax.random.split(key, 4)
    dim, output_dim = 8, 12

    # 12x12 block (SE uses the 144-wide `se` head)
    params12 = init_params(kp12, dim=dim, size=12, output_dim=output_dim)
    x12 = jax.random.normal(kx12, (dim, 12, 12), jnp.float32)
    fwd12 = build_decoder_block(params12, dim=dim, size=12)
    y12 = jax.block_until_ready(fwd12(x12))
    r12 = ref_forward(x12, params12)
    assert y12.shape == x12.shape
    assert bool(jnp.allclose(y12, r12, atol=5e-3, rtol=5e-3)), \
        float(jnp.max(jnp.abs(y12 - r12)))

    # 6x6 block (SE uses the 36-wide `se2` head)
    params6 = init_params(kp6, dim=dim, size=6, output_dim=output_dim)
    x6 = jax.random.normal(kx6, (dim, 6, 6), jnp.float32)
    fwd6 = build_decoder_block(params6, dim=dim, size=6)
    y6 = jax.block_until_ready(fwd6(x6))
    r6 = ref_forward(x6, params6)
    assert y6.shape == x6.shape
    assert bool(jnp.allclose(y6, r6, atol=5e-3, rtol=5e-3)), \
        float(jnp.max(jnp.abs(y6 - r6)))

    print("KERNEL_OK")
</pallas_src>

<mosaic_0001>
module attributes {stable_mosaic.version = 11 : i64} {
  func.func @k(%arg0: memref<8x128xf32, #tpu.memory_space<vmem>>, %arg1: memref<8x128xf32, #tpu.memory_space<vmem>>) attributes {dimension_semantics = [], scalar_prefetch = 0 : i64, scratch_operands = 0 : i64, tpu.core_type = #tpu.core_type<tc>} {
    %c0 = arith.constant 0 : index
    %c0_0 = arith.constant 0 : index
    %0 = vector.load %arg0[%c0, %c0_0] : memref<8x128xf32, #tpu.memory_space<vmem>>, vector<8x128xf32>
    %c1_i32 = arith.constant 1 : i32
    %1 = tpu.dynamic_rotate %0 by %c1_i32 dim 1 : vector<8x128xf32>, i32 -> vector<8x128xf32>
    %c0_1 = arith.constant 0 : index
    %c0_2 = arith.constant 0 : index
    %2 = vector.load %arg1[%c0_1, %c0_2] : memref<8x128xf32, #tpu.memory_space<vmem>>, vector<8x128xf32>
    tpu.vector_store %arg1[%c0_1, %c0_2], %1 {strides = array<i32>} : memref<8x128xf32, #tpu.memory_space<vmem>>, vector<8x128xf32>,
    return
  }
}

</mosaic_0001>

<bundles_post_ra>
// kernel: tpu_custom_call.1
= control target key start
LH: loop header
LB: loop body
LE: loop exit
PB: predicated region body
PF: predicated region fallthrough
CT: control target
= control target key end

     0   :  { %6 = vsyncpa [#allocation3], 0  ;;  %s106_s0 = inlined_call_operand.hbm [shape: f32[8,128], index: 0, kind: input, shape index: {}]   ;;  %s107_s1 = inlined_call_operand.hbm [shape: f32[8,128], index: 1, kind: output, shape index: {}]  }
   0x1   :  { %7 = vsyncpa [#allocation4], 0  ;;  %s87_s6 = smov [#allocation2]  }
   0x2   :  { %s14_s7 = sshll.u32 %s87_s6, 4  ;;  %s15_s7 = int_to_ptr.vmem [resolvable:$true] %s14_s7 }
   0x3   :  { %s51_s8 = scalar_lea.vmem %s15_s7, 128  ;;  %p56_p1 = scmp.lt.s32.totalorder %s15_s7, %s15_s7 }
   0x4   :  { %p52_p0 = scmp.ne.s32.totalorder %s15_s7, %s51_s8  ;;  %p57_p2 = scmp.lt.s32.totalorder %s51_s8, %s51_s8 }
   0x6   :  { %p58_p3 = por %p57_p2, %p56_p1 }
   0x8   :  { %p59_p4 = pnand %p58_p3, %p52_p0 }
   0xa   :  { %62 = shalt.err (!%p59_p4)
}
   0xb   :  { %17 = dma.hbm_to_vmem [thread:$0]  %s106_s0, 128, %s15_s7, [#allocation3]  }
   0xc   :  { %83 = dma.done.wait [#allocation3], 128  }
   0xd   :  { %84 = vsyncadd [#allocation3], 4294967168  ;;  %v21_v0 = vld [vmem:[#allocation2] sm:$0xff]  ;;  %s88_s11 = smov 1   ;;  %s89_s12 = smov [#allocation5]  }
   0xe   :  { %22 = vrot.lane.b32.xlu0 %v21_v0, %s88_s11  ;;  %s31_s13 = sshll.u32 %s89_s12, 4  ;;  %s32_s13 = int_to_ptr.vmem [resolvable:$true] %s31_s13 }
   0xf   :  { %s63_s14 = scalar_lea.vmem %s32_s13, 128  ;;  %p68_p6 = scmp.lt.s32.totalorder %s32_s13, %s32_s13 }
  0x10   :  { %p64_p5 = scmp.ne.s32.totalorder %s32_s13, %s63_s14  ;;  %p69_p7 = scmp.lt.s32.totalorder %s63_s14, %s63_s14 }
  0x12   :  { %p70_p8 = por %p69_p7, %p68_p6 }
  0x14   :  { %p71_p9 = pnand %p70_p8, %p64_p5 }
  0x80   :  { %v23_v1 = vpop.permute.xlu0 %22 }
  0x81   :  { %24 = vst [vmem:[#allocation5] sm:$0xff] %v23_v1 }
  0x82   :  { %74 = shalt.err (!%p71_p9)
}
  0x83   :  { %34 = dma.vmem_to_hbm [thread:$0]  %s32_s13, 128, %s107_s1, [#allocation4]  }
  0x84   :  { %85 = dma.done.wait [#allocation4], 128  }
  0x85   :  { %86 = vsyncadd [#allocation4], 4294967168 }
  0x86   :  { %38 = vsyncpa [#allocation3], 1 }
  0x87   :  { %39 = vsyncpa [#allocation4], 1 }

</bundles_post_ra>
